<compile_context>
chip_gen: v5e
topology: v5e:2x2
jax: 0.10.0
libtpu: 0.0.40
codegen_flags: <defaults>
</compile_context>

<pallas_src>
import math

import jax
import jax.numpy as jnp
from jax.experimental import pallas as pl
from jax.experimental.pallas import tpu as pltpu

_LANES = 128
_GROUP_ROWS = 256  # sublane-group chunk per fori_loop iteration (multiple of 8)


def _round_up(x, m):
    return ((x + m - 1) // m) * m


def _make_focal_bce_kernel(tr, grp, valid_rows, needs_mask):
    """Kernel computing per-block (8,128) partial sums of BCE-with-logits."""
    n_grp = tr // grp

    def kernel(preds_ref, targets_ref, out_ref):
        block_row0 = pl.program_id(0) * tr

        def body(g, acc):
            r0 = pl.multiple_of(g * grp, grp)
            x = preds_ref[pl.ds(r0, grp), :].astype(jnp.float32)
            t = targets_ref[pl.ds(r0, grp), :].astype(jnp.float32)

            if needs_mask:
                # Only the last (partial) block contains rows past `valid_rows`;
                # mask BEFORE exp/log so Pallas-padded garbage cannot inject
                # NaN/Inf.  (x=-100, t=0) gives an exactly-zero BCE term in f32.
                row = (block_row0 + r0
                       + jax.lax.broadcasted_iota(jnp.int32, (grp, _LANES), 0))
                valid = row < valid_rows
                x = jnp.where(valid, x, -100.0)
                t = jnp.where(valid, t, 0.0)

            # Numerically stable BCE-with-logits (matches PyTorch):
            #   max(x,0) - x*t + log1p(exp(-|x|))
            bce = jnp.maximum(x, 0.0) - x * t + jnp.log1p(jnp.exp(-jnp.abs(x)))

            # Fold sublane groups: (grp,128) -> (grp//8, 8, 128), reduce leading
            # axis (layout-preserving, VPU adds only) into the vreg accumulator.
            return acc + jnp.sum(bce.reshape(grp // 8, 8, _LANES), axis=0)

        acc = jax.lax.fori_loop(0, n_grp, body,
                                jnp.zeros((8, _LANES), jnp.float32))
        out_ref[...] = acc[None]  # (1, 8, 128)

    return kernel


def focal_loss(preds, targets, alpha=0.4, gamma=1.0, *, row_tile=4096):
    """Pallas implementation of FocalLoss.forward.  Returns scalar float32."""
    assert preds.shape == targets.shape
    total = math.prod(preds.shape)

    full_rows, tail = divmod(total, _LANES)
    rows0 = full_rows + (1 if tail else 0)

    pf = preds.reshape(-1)
    tf = targets.reshape(-1)

    R = rows0
    if tail or rows0 < 8:
        # Minimal pad: only when `total` is not a multiple of 128 (the (R,128)
        # reshape needs it) or the array is tiny.  Filled with (-100, 0) which
        # contributes exactly 0 BCE, so no extra masking is required for it.
        # (The big over-pad to a multiple of tr*128 from the previous version
        #  is gone — that cost a full extra HBM pass over both inputs.)
        R = max(8, _round_up(rows0, 8))
        pad = R * _LANES - total
        pf = jnp.pad(pf, (0, pad), constant_values=-100.0)
        tf = jnp.pad(tf, (0, pad), constant_values=0.0)
    pf = pf.reshape(R, _LANES)
    tf = tf.reshape(R, _LANES)

    # Row tile: multiple of 8, never larger than the array (all blocks start
    # in-bounds; only the last block may be partial and is handled by the mask).
    tr = max(8, (min(row_tile, R) // 8) * 8)
    grp = math.gcd(tr, _GROUP_ROWS)           # multiple of 8 dividing tr
    needs_mask = (R % tr) != 0
    num_blocks = -(-R // tr)

    # VMEM budget derived from the tile: 2 inputs x 2 pipeline buffers x block
    # bytes + slack for the small per-group intermediates / outputs.
    p_bytes = tr * _LANES * jnp.dtype(pf.dtype).itemsize
    t_bytes = tr * _LANES * jnp.dtype(tf.dtype).itemsize
    vmem_limit = max(16 * 1024 * 1024, int(2 * (p_bytes + t_bytes)) + 8 * 1024 * 1024)

    partials = pl.pallas_call(
        _make_focal_bce_kernel(tr, grp, R, needs_mask),
        out_shape=jax.ShapeDtypeStruct((num_blocks, 8, _LANES), jnp.float32),
        grid=(num_blocks,),
        in_specs=[
            pl.BlockSpec((tr, _LANES), lambda i: (i, 0)),
            pl.BlockSpec((tr, _LANES), lambda i: (i, 0)),
        ],
        out_specs=pl.BlockSpec((1, 8, _LANES), lambda i: (i, 0, 0)),
        compiler_params=pltpu.CompilerParams(
            dimension_semantics=("parallel",),
            vmem_limit_bytes=vmem_limit,
        ),
    )(pf, tf)

    # Final reduction over a handful of floats + scalar focal transform: free.
    bce_mean = jnp.sum(partials) / total
    return alpha * (1.0 - jnp.exp(-bce_mean)) ** gamma * bce_mean


def focal_loss_ref(preds, targets, alpha=0.4, gamma=1.0):
    """Pure-JAX reference mirroring the PyTorch FocalLoss module exactly."""
    x = preds.astype(jnp.float32)
    t = targets.astype(jnp.float32)
    bce_elem = jnp.maximum(x, 0.0) - x * t + jnp.log1p(jnp.exp(-jnp.abs(x)))
    bce = jnp.mean(bce_elem)
    return alpha * (1.0 - jnp.exp(-bce)) ** gamma * bce


if __name__ == "__main__":
    key = jax.random.PRNGKey(0)
    k1, k2 = jax.random.split(key)

    # Shapes implied by the module: (N, C, H, W) logits + {0,1} targets.
    N, C, H, W = 2, 4, 16, 16
    preds = jax.random.normal(k1, (N, C, H, W), dtype=jnp.float32)
    targets = (jax.random.uniform(k2, (N, C, H, W)) > 0.5).astype(jnp.float32)

    loss = jax.block_until_ready(focal_loss(preds, targets))
    ref = focal_loss_ref(preds, targets)
    assert jnp.allclose(loss, ref, atol=1e-5, rtol=1e-5), (loss, ref)

    # Ragged shape (element count not a multiple of 128): exercises the
    # minimal safe (-100, 0) lane pad path.
    k3, k4 = jax.random.split(k1)
    preds2 = jax.random.normal(k3, (2, 3, 9, 11), dtype=jnp.float32)
    targets2 = (jax.random.uniform(k4, (2, 3, 9, 11)) > 0.5).astype(jnp.float32)
    loss2 = jax.block_until_ready(focal_loss(preds2, targets2))
    ref2 = focal_loss_ref(preds2, targets2)
    assert jnp.allclose(loss2, ref2, atol=1e-5, rtol=1e-5), (loss2, ref2)

    print("KERNEL_OK")
</pallas_src>

<mosaic_0001>
module attributes {stable_mosaic.version = 11 : i64} {
  func.func @kernel(%arg0: i32, %arg1: memref<16x128xf32, #tpu.memory_space<vmem>>, %arg2: memref<16x128xf32, #tpu.memory_space<vmem>>, %arg3: memref<1x8x128xf32, #tpu.memory_space<vmem>>) attributes {dimension_semantics = [#tpu.dimension_semantics<parallel>], iteration_bounds = array<i64: 1>, scalar_prefetch = 0 : i64, scratch_operands = 0 : i64, tpu.core_type = #tpu.core_type<tc>, window_params = [{transform_indices = @transform_0, window_bounds = array<i64: 16, 128>}, {transform_indices = @transform_1, window_bounds = array<i64: 16, 128>}, {transform_indices = @transform_2, window_bounds = array<i64: 1, 8, 128>}]} {
    %cst = arith.constant 0.000000e+00 : f32
    %0 = vector.broadcast %cst : f32 to vector<8x128xf32>
    %c0_i32 = arith.constant 0 : i32
    %c16_i32 = arith.constant 16 : i32
    %1 = arith.muli %c0_i32, %c16_i32 : i32
    %2 = tpu.assume_multiple %1, 16 : i32
    %3 = arith.index_cast %2 : i32 to index
    %c0 = arith.constant 0 : index
    %4 = vector.load %arg1[%3, %c0] : memref<16x128xf32, #tpu.memory_space<vmem>>, vector<16x128xf32>
    %5 = arith.index_cast %2 : i32 to index
    %c0_0 = arith.constant 0 : index
    %6 = vector.load %arg2[%5, %c0_0] : memref<16x128xf32, #tpu.memory_space<vmem>>, vector<16x128xf32>
    %cst_1 = arith.constant 0.000000e+00 : f32
    %7 = vector.broadcast %cst_1 : f32 to vector<16x128xf32>
    %8 = arith.maximumf %4, %7 : vector<16x128xf32>
    %9 = arith.mulf %4, %6 : vector<16x128xf32>
    %10 = arith.subf %8, %9 : vector<16x128xf32>
    %11 = math.absf %4 : vector<16x128xf32>
    %cst_2 = arith.constant 0.000000e+00 : f32
    %12 = vector.broadcast %cst_2 : f32 to vector<16x128xf32>
    %13 = arith.subf %12, %11 : vector<16x128xf32>
    %14 = math.exp %13 : vector<16x128xf32>
    %15 = math.log1p %14 : vector<16x128xf32>
    %16 = arith.addf %10, %15 : vector<16x128xf32>
    %17 = vector.shape_cast %16 : vector<16x128xf32> to vector<2x8x128xf32>
    %cst_3 = arith.constant dense<0.000000e+00> : vector<8x128xf32>
    %18 = vector.multi_reduction <add>, %17, %cst_3 [0] : vector<2x8x128xf32> to vector<8x128xf32>
    %19 = arith.addf %0, %18 : vector<8x128xf32>
    %c1_i32 = arith.constant 1 : i32
    %20 = vector.shape_cast %19 : vector<8x128xf32> to vector<1x8x128xf32>
    %c0_4 = arith.constant 0 : index
    %c0_5 = arith.constant 0 : index
    %c0_6 = arith.constant 0 : index
    %21 = vector.load %arg3[%c0_4, %c0_5, %c0_6] : memref<1x8x128xf32, #tpu.memory_space<vmem>>, vector<1x8x128xf32>
    tpu.vector_store %arg3[%c0_4, %c0_5, %c0_6], %20 {strides = array<i32>} : memref<1x8x128xf32, #tpu.memory_space<vmem>>, vector<1x8x128xf32>,
    return
  }
  func.func @transform_0(%arg0: i32) -> (i32, i32) {
    %c0_i32 = arith.constant 0 : i32
    %c0_i32_0 = arith.constant 0 : i32
    return %arg0, %c0_i32 : i32, i32
  }
  func.func @transform_1(%arg0: i32) -> (i32, i32) {
    %c0_i32 = arith.constant 0 : i32
    %c0_i32_0 = arith.constant 0 : i32
    return %arg0, %c0_i32 : i32, i32
  }
  func.func @transform_2(%arg0: i32) -> (i32, i32, i32) {
    %c0_i32 = arith.constant 0 : i32
    %c0_i32_0 = arith.constant 0 : i32
    %c0_i32_1 = arith.constant 0 : i32
    return %arg0, %c0_i32, %c0_i32_0 : i32, i32, i32
  }
}

</mosaic_0001>

<bundles_post_ra>
// kernel: tpu_custom_call.1
= control target key start
LH: loop header
LB: loop body
LE: loop exit
PB: predicated region body
PF: predicated region fallthrough
CT: control target
= control target key end

     0   :  { %7 = vsyncpa [#allocation3], 0  ;;  %s223_s0 = inlined_call_operand.hbm [shape: f32[16,128], index: 0, kind: input, shape index: {}]   ;;  %s224_s1 = inlined_call_operand.hbm [shape: f32[16,128], index: 1, kind: input, shape index: {}]   ;;  %s225_s2 = inlined_call_operand.hbm [shape: f32[1,8,128], index: 2, kind: output, shape index: {}]  }
   0x1   :  { %8 = vsyncpa [#allocation6], 0 }
   0x2   :  { %9 = vsyncpa [#allocation4], 0  ;;  %s14_s11 = sshll.u32 %s223_s0, 4  ;;  %s194_s12 = smov [#allocation2]   ;;  %s15_s11 = int_to_ptr.hbm [resolvable:$true] %s14_s11 }
   0x3   :  { %s16_s13 = sshll.u32 %s194_s12, 4  ;;  %s27_s16 = sshll.u32 %s224_s1, 4  ;;  %s17_s13 = int_to_ptr.vmem [resolvable:$true] %s16_s13  ;;  %s28_s16 = int_to_ptr.hbm [resolvable:$true] %s27_s16 }
   0x4   :  { %s195_s17 = smov 128   ;;  %s196_s18 = smov 8  }
   0x5   :  { %22 = dma.hbm_to_vmem [thread:$0]  %s15_s11, 256, %s17_s13, [#allocation3], %s195_s17, %s195_s17, %s196_s18  }
   0x6   :  { %s197_s19 = smov [#allocation5]  }
   0x7   :  { %s29_s20 = sshll.u32 %s197_s19, 4  ;;  %s30_s20 = int_to_ptr.vmem [resolvable:$true] %s29_s20 }
   0x8   :  { %35 = dma.hbm_to_vmem [thread:$0]  %s28_s16, 256, %s30_s20, [#allocation6], %s195_s17, %s195_s17, %s196_s18  }
   0x9   :  { %188 = dma.done.wait [#allocation3], 256  }
   0xa   :  { %189 = vsyncadd [#allocation3], 4294967040 }
   0xb   :  { %190 = dma.done.wait [#allocation6], 256  }
   0xc   :  { %191 = vsyncadd [#allocation6], 4294967040  ;;  %v44_v0 = vld [vmem:[#allocation2] sm:$0xff]  ;;  %v45_v1 = vld [vmem:[#allocation2 + $0x8] sm:$0xff]  ;;  %s198_s0 = smov [#allocation7]   ;;  %s92_s23 = sshll.u32 %s225_s2, 4  ;;  %s93_s23 = int_to_ptr.hbm [resolvable:$true] %s92_s23 }
   0xd   :  { %v54_v2 = vand.u32 2147483647, %v44_v0  ;;  %v55_v3 = vand.u32 2147483647, %v45_v1  ;;  %v46_v12 = vld [vmem:[#allocation5] sm:$0xff]  ;;  %v47_v15 = vld [vmem:[#allocation5 + $0x8] sm:$0xff] }
   0xe   :  { %v48_v17 = vmax.f32 %v44_v0, 0.0  ;;  %v50_v18 = vmul.f32 %v46_v12, %v44_v0  ;;  %v49_v21 = vmax.f32 %v45_v1, 0.0  ;;  %v51_v22 = vmul.f32 %v47_v15, %v45_v1  ;;  %s90_s1 = sshll.u32 %s198_s0, 4  ;;  %s91_s1 = int_to_ptr.vmem [resolvable:$true] %s90_s1 }
   0xf   :  { %v56_v4 = vsub.f32 0.0, %v54_v2  ;;  %v57_v5 = vsub.f32 0.0, %v55_v3 }
  0x10   :  { %v52_v26 = vsub.f32 %v48_v17, %v50_v18  ;;  %v53_v29 = vsub.f32 %v49_v21, %v51_v22 }
  0x11   :  { %v58_v6 = vmul.f32 1.442695, %v56_v4  ;;  %v60_v7 = vmul.f32 1.442695, %v57_v5 }
  0x13   :  { %108 = vpow2.f32 %v58_v6 }
  0x14   :  { %110 = vpow2.f32 %v60_v7 }
  0x19   :  { %v109_v8 = vpop.eup %108 }
  0x1a   :  { %v111_v9 = vpop.eup %110  ;;  %v62_v10 = vadd.f32 1.0, %v109_v8  ;;  %v65_v11 = vmul.f32 -0.5, %v109_v8  ;;  %v68_v19 = vand.u32 2147483647, %v109_v8 }
  0x1b   :  { %v71_v13 = vadd.f32 1.0, %v111_v9  ;;  %v74_v14 = vmul.f32 -0.5, %v111_v9  ;;  %v77_v23 = vand.u32 2147483647, %v111_v9 }
  0x1c   :  { %112 = vlog2.f32 %v62_v10  ;;  %v66_v16 = vadd.f32 1.0, %v65_v11  ;;  %vm69_vm0 = vcmp.lt.f32.partialorder %v68_v19, 0.0004427343 }
  0x1d   :  { %114 = vlog2.f32 %v71_v13  ;;  %v75_v20 = vadd.f32 1.0, %v74_v14  ;;  %vm78_vm1 = vcmp.lt.f32.partialorder %v77_v23, 0.0004427343 }
  0x1e   :  { %v67_v24 = vmul.f32 %v109_v8, %v66_v16 }
  0x1f   :  { %v76_v27 = vmul.f32 %v111_v9, %v75_v20 }
  0x22   :  { %v113_v25 = vpop.eup %112 }
  0x23   :  { %v115_v28 = vpop.eup %114  ;;  %v64_v30 = vmul.f32 0.6931472, %v113_v25 }
  0x24   :  { %v73_v31 = vmul.f32 0.6931472, %v115_v28 }
  0x25   :  { %v70_v32 = vsel %vm69_vm0, %v67_v24, %v64_v30 }
  0x26   :  { %v79_v33 = vsel %vm78_vm1, %v76_v27, %v73_v31  ;;  %v80_v34 = vadd.f32 %v70_v32, %v52_v26 }
  0x27   :  { %v81_v35 = vadd.f32 %v79_v33, %v53_v29 }
  0x29   :  { %v82_v36 = vadd.f32 %v81_v35, %v80_v34 }
  0x2b   :  { %84 = vst [vmem:[#allocation7] sm:$0xff] %v82_v36 }
  0x2c   :  { %95 = dma.vmem_to_hbm [thread:$0]  %s91_s1, 128, %s93_s23, [#allocation4]  }
  0x2d   :  { %192 = dma.done.wait [#allocation4], 128  }
  0x2e   :  { %193 = vsyncadd [#allocation4], 4294967168 }
  0x2f   :  { %100 = vsyncpa [#allocation3], 1 }
  0x30   :  { %101 = vsyncpa [#allocation6], 1 }
  0x31   :  { %102 = vsyncpa [#allocation4], 1 }

</bundles_post_ra>
